<compile_context>
chip_gen: v6e
topology: v6e:2x2x1
jax: 0.10.0
libtpu: 0.0.40
codegen_flags: <defaults>
</compile_context>

<pallas_src>
import functools

import jax
import jax.numpy as jnp
from jax import lax
from jax.experimental import pallas as pl
from jax.experimental.pallas import tpu as pltpu


def bottleneck_kernel(x_ref, w1_ref, b1_ref, w2_ref, b2_ref, w3_ref, b3_ref,
                      out_ref, pad_ref, im2col_ref, *, H, W, top):
    """Fused 1x1+BN+ReLU -> 3x3(pad=1)+BN+ReLU -> 1x1+BN -> +identity -> ReLU.

    Per grid step (one image):
      x_ref      : (1, H*W, Cin)      compute dtype (f32 or bf16)
      w1_ref     : (Cin, width)       BN1 scale folded in;  b1 : (1, width) f32
      w2_ref     : (9*width, width)   BN2 scale folded in;  b2 : (1, width) f32
      w3_ref     : (width, Cout)      BN3 scale folded in;  b3 : (1, Cout)  f32
      out_ref    : (1, H*W, Cout) f32
      pad_ref    : VMEM (H*W + 2*top, width) compute dtype  (H-padded conv2 act)
      im2col_ref : VMEM (H*W, 9*width)       compute dtype  (K-folded conv2 in)
    """
    HW = H * W
    width = w1_ref.shape[1]
    cd = w1_ref.dtype  # matmul compute dtype; accumulation/epilogues are f32

    x2d = x_ref[0]                                           # (HW, Cin) cd

    # ---- conv1 (1x1) as one plane-level matmul; BN bias + ReLU in f32.
    h1 = jnp.dot(x2d, w1_ref[...], preferred_element_type=jnp.float32)
    h1 = jnp.maximum(h1 + b1_ref[...], 0.0)                  # (HW, width) f32

    # ---- conv2 padded activation: H-only padding, flat layout, one
    #      contiguous lane-dense interior store.  Padding rows zeroed each step.
    zpad = jnp.zeros((top, width), cd)
    pad_ref[0:top, :] = zpad
    pad_ref[top + HW:top + HW + top, :] = zpad
    pad_ref[top:top + HW, :] = h1.astype(cd)

    # Column-edge masks: in the flat (h*W + w) index, a +-1 shift wraps across
    # image rows, so the out-of-image column must be zeroed.
    ridx = lax.broadcasted_iota(jnp.int32, (HW, 1), 0)
    wcol = ridx % W
    keep_l = (wcol != 0).astype(cd)          # valid when reading column w-1
    keep_r = (wcol != (W - 1)).astype(cd)    # valid when reading column w+1

    # ---- build im2col slab (HW, 9*width): tap (ky,kx) = flat rows shifted by
    #      (ky-1)*W + (kx-1); row out-of-bounds handled by the zero pad rows.
    for ky in range(3):
        for kx in range(3):
            k = ky * 3 + kx
            off = top + (ky - 1) * W + (kx - 1)              # static offset
            tap = pad_ref[off:off + HW, :]
            if kx == 0:
                tap = tap * keep_l
            elif kx == 2:
                tap = tap * keep_r
            im2col_ref[:, k * width:(k + 1) * width] = tap

    # ---- conv2 (3x3) as ONE matmul with the 9 taps folded into K.
    h2 = jnp.dot(im2col_ref[...], w2_ref[...],
                 preferred_element_type=jnp.float32)          # (HW, width) f32
    h2 = jnp.maximum(h2 + b2_ref[...], 0.0)

    # ---- conv3 (1x1) + BN bias + residual + ReLU; single lane-dense store.
    h3 = jnp.dot(h2.astype(cd), w3_ref[...],
                 preferred_element_type=jnp.float32)          # (HW, Cout) f32
    out = jnp.maximum(h3 + b3_ref[...] + x2d.astype(jnp.float32), 0.0)
    out_ref[0, :, :] = out.astype(out_ref.dtype)


def bottleneck_forward(x, params, *, compute_dtype=jnp.float32,
                       vmem_limit_bytes=48 * 1024 * 1024):
    """x: (N, H, W, Cin) float32 NHWC.  Returns (N, H, W, Cout) float32."""
    w1, s1, b1, w2, s2, b2, w3, s3, b3 = params
    N, H, W, Cin = x.shape
    width = w1.shape[1]
    Cout = w3.shape[1]
    assert Cin == Cout, "stride=1 / downsample=None requires inplanes == planes*4"
    HW = H * W
    top = W + 8  # >= W+1 halo rows for the flat conv2 buffer

    # Pre-cast activations to the compute dtype (halves input DMA for bf16).
    x2 = x.reshape(N, HW, Cin).astype(compute_dtype)

    # Fold BN scales into the conv weights (per output channel); keep biases.
    w1c = (w1 * s1).astype(compute_dtype)                        # (Cin, width)
    w2c = (w2 * s2[None]).astype(compute_dtype).reshape(9 * width, width)
    w3c = (w3 * s3).astype(compute_dtype)                        # (width, Cout)

    full = lambda a: pl.BlockSpec(a.shape, lambda n: (0,) * a.ndim)
    kernel = functools.partial(bottleneck_kernel, H=H, W=W, top=top)

    itemsize = jnp.dtype(compute_dtype).itemsize
    flops = 2 * N * HW * (Cin * width + 9 * width * width + width * Cout)
    bytes_accessed = int(
        N * HW * Cin * itemsize + N * HW * Cout * 4
        + (w1c.size + w2c.size + w3c.size) * itemsize
        + (b1.size + b2.size + b3.size) * 4)

    out2 = pl.pallas_call(
        kernel,
        out_shape=jax.ShapeDtypeStruct((N, HW, Cout), jnp.float32),
        grid_spec=pltpu.PrefetchScalarGridSpec(
            num_scalar_prefetch=0,
            grid=(N,),
            in_specs=[
                pl.BlockSpec((1, HW, Cin), lambda n: (n, 0, 0)),   # x per image
                full(w1c), full(b1),
                full(w2c), full(b2),
                full(w3c), full(b3),
            ],
            out_specs=pl.BlockSpec((1, HW, Cout), lambda n: (n, 0, 0)),
            scratch_shapes=[
                pltpu.VMEM((HW + 2 * top, width), compute_dtype),  # conv2 padded act
                pltpu.VMEM((HW, 9 * width), compute_dtype),        # conv2 im2col slab
            ],
        ),
        compiler_params=pltpu.CompilerParams(
            dimension_semantics=("parallel",),
            vmem_limit_bytes=vmem_limit_bytes),
        cost_estimate=pl.CostEstimate(
            flops=flops, transcendentals=0, bytes_accessed=bytes_accessed),
    )(x2, w1c, b1, w2c, b2, w3c, b3)
    return out2.reshape(N, H, W, Cout)


def bottleneck_reference(x, params):
    """Plain-JAX reference (NHWC) for correctness checking."""
    w1, s1, b1, w2, s2, b2, w3, s3, b3 = params
    width = w1.shape[1]
    h = jnp.einsum('nhwc,cd->nhwd', x, w1) * s1 + b1
    h = jnp.maximum(h, 0.0)
    w2_hwio = w2.reshape(3, 3, width, width)
    h = lax.conv_general_dilated(h, w2_hwio, window_strides=(1, 1),
                                 padding='SAME',
                                 dimension_numbers=('NHWC', 'HWIO', 'NHWC'))
    h = jnp.maximum(h * s2 + b2, 0.0)
    h = jnp.einsum('nhwc,cd->nhwd', h, w3) * s3 + b3
    return jnp.maximum(h + x, 0.0)


def make_params(key, inplanes, planes, base_width=64, groups=1, eps=1e-5):
    """Deterministic parameter init; BN folded into per-channel scale/bias."""
    expansion = 4
    width = int(planes * (base_width / 64.0)) * groups
    cout = planes * expansion
    ks = jax.random.split(key, 12)

    def bn_fold(kg, kb, km, kv, c):
        gamma = 1.0 + 0.1 * jax.random.normal(kg, (c,), jnp.float32)
        beta = 0.1 * jax.random.normal(kb, (c,), jnp.float32)
        mean = 0.1 * jax.random.normal(km, (c,), jnp.float32)
        var = jnp.abs(jax.random.normal(kv, (c,), jnp.float32)) + 0.5
        scale = gamma / jnp.sqrt(var + eps)
        bias = beta - mean * scale
        return scale.reshape(1, c), bias.reshape(1, c)

    w1 = 0.2 * jax.random.normal(ks[0], (inplanes, width), jnp.float32)
    s1, b1 = bn_fold(ks[1], ks[2], ks[3], ks[4], width)
    w2 = 0.2 * jax.random.normal(ks[5], (9, width, width), jnp.float32)
    s2, b2 = bn_fold(ks[6], ks[7], ks[8], ks[9], width)
    w3 = 0.2 * jax.random.normal(ks[10], (width, cout), jnp.float32)
    s3, b3 = bn_fold(ks[11], ks[0], ks[1], ks[2], cout)
    return (w1, s1, b1, w2, s2, b2, w3, s3, b3)


if __name__ == "__main__":
    # Small shapes: inplanes=16, planes=4 -> width=4, out channels=16
    # (== inplanes, so the residual add is valid with downsample=None, stride=1).
    N, H, W, INPLANES, PLANES = 2, 8, 8, 16, 4

    key = jax.random.PRNGKey(0)
    kx_, kp = jax.random.split(key)
    x_nchw = jax.random.normal(kx_, (N, INPLANES, H, W), jnp.float32)  # PyTorch layout
    x = jnp.transpose(x_nchw, (0, 2, 3, 1))                            # -> NHWC

    params = make_params(kp, INPLANES, PLANES)
    ref = jax.block_until_ready(bottleneck_reference(x, params))

    # f32 matmuls: tight tolerance.
    out = jax.block_until_ready(bottleneck_forward(x, params))
    assert out.shape == (N, H, W, PLANES * 4)
    assert jnp.allclose(out, ref, atol=1e-4, rtol=1e-4), (
        f"f32 max abs err {jnp.max(jnp.abs(out - ref))}")

    # bf16 activations + matmul inputs (f32 accumulation / epilogue): looser tol.
    out_bf16 = jax.block_until_ready(
        bottleneck_forward(x, params, compute_dtype=jnp.bfloat16))
    assert jnp.allclose(out_bf16, ref, atol=2e-1, rtol=5e-2), (
        f"bf16 max abs err {jnp.max(jnp.abs(out_bf16 - ref))}")

    print("KERNEL_OK")
</pallas_src>

<mosaic_0001>
module attributes {stable_mosaic.version = 11 : i64} {
  func.func @bottleneck_kernel(%arg0: i32, %arg1: memref<1x64x16xf32, #tpu.memory_space<vmem>>, %arg2: memref<16x4xf32, #tpu.memory_space<vmem>>, %arg3: memref<1x4xf32, #tpu.memory_space<vmem>>, %arg4: memref<36x4xf32, #tpu.memory_space<vmem>>, %arg5: memref<1x4xf32, #tpu.memory_space<vmem>>, %arg6: memref<4x16xf32, #tpu.memory_space<vmem>>, %arg7: memref<1x16xf32, #tpu.memory_space<vmem>>, %arg8: memref<1x64x16xf32, #tpu.memory_space<vmem>>, %arg9: memref<96x4xf32, #tpu.memory_space<vmem>>, %arg10: memref<64x36xf32, #tpu.memory_space<vmem>>) attributes {dimension_semantics = [#tpu.dimension_semantics<parallel>], iteration_bounds = array<i64: 2>, scalar_prefetch = 0 : i64, scratch_operands = 2 : i64, tpu.core_type = #tpu.core_type<tc>, window_params = [{transform_indices = @transform_0, window_bounds = array<i64: 1, 64, 16>}, {pipeline_mode = #tpu.pipeline_mode<synchronous>, transform_indices = @transform_1, window_bounds = array<i64: 16, 4>}, {pipeline_mode = #tpu.pipeline_mode<synchronous>, transform_indices = @transform_2, window_bounds = array<i64: 1, 4>}, {pipeline_mode = #tpu.pipeline_mode<synchronous>, transform_indices = @transform_3, window_bounds = array<i64: 36, 4>}, {pipeline_mode = #tpu.pipeline_mode<synchronous>, transform_indices = @transform_4, window_bounds = array<i64: 1, 4>}, {pipeline_mode = #tpu.pipeline_mode<synchronous>, transform_indices = @transform_5, window_bounds = array<i64: 4, 16>}, {pipeline_mode = #tpu.pipeline_mode<synchronous>, transform_indices = @transform_6, window_bounds = array<i64: 1, 16>}, {transform_indices = @transform_7, window_bounds = array<i64: 1, 64, 16>}]} {
    %c0 = arith.constant 0 : index
    %c0_0 = arith.constant 0 : index
    %c0_1 = arith.constant 0 : index
    %0 = vector.load %arg1[%c0, %c0_0, %c0_1] : memref<1x64x16xf32, #tpu.memory_space<vmem>>, vector<1x64x16xf32>
    %1 = vector.shape_cast %0 : vector<1x64x16xf32> to vector<64x16xf32>
    %c0_2 = arith.constant 0 : index
    %c0_3 = arith.constant 0 : index
    %2 = vector.load %arg2[%c0_2, %c0_3] : memref<16x4xf32, #tpu.memory_space<vmem>>, vector<16x4xf32>
    %cst = arith.constant dense<0.000000e+00> : vector<64x4xf32>
    %3 = tpu.matmul %1, %2, %cst {dimension_numbers = #tpu.dot_dimension_numbers<[1], [0], [0], [1], [0, 0, 1, 1], [], []>} : vector<64x16xf32>, vector<16x4xf32>, vector<64x4xf32> -> vector<64x4xf32>
    %c0_4 = arith.constant 0 : index
    %c0_5 = arith.constant 0 : index
    %4 = vector.load %arg3[%c0_4, %c0_5] : memref<1x4xf32, #tpu.memory_space<vmem>>, vector<1x4xf32>
    %5 = vector.broadcast %4 : vector<1x4xf32> to vector<64x4xf32>
    %6 = arith.addf %3, %5 : vector<64x4xf32>
    %cst_6 = arith.constant 0.000000e+00 : f32
    %7 = vector.broadcast %cst_6 : f32 to vector<64x4xf32>
    %8 = arith.maximumf %6, %7 : vector<64x4xf32>
    %cst_7 = arith.constant 0.000000e+00 : f32
    %9 = vector.broadcast %cst_7 : f32 to vector<16x4xf32>
    %c0_8 = arith.constant 0 : index
    %c0_9 = arith.constant 0 : index
    %10 = vector.load %arg9[%c0_8, %c0_9] : memref<96x4xf32, #tpu.memory_space<vmem>>, vector<16x4xf32>
    tpu.vector_store %arg9[%c0_8, %c0_9], %9 {strides = array<i32>} : memref<96x4xf32, #tpu.memory_space<vmem>>, vector<16x4xf32>,
    %c80 = arith.constant 80 : index
    %c0_10 = arith.constant 0 : index
    %11 = vector.load %arg9[%c80, %c0_10] : memref<96x4xf32, #tpu.memory_space<vmem>>, vector<16x4xf32>
    tpu.vector_store %arg9[%c80, %c0_10], %9 {strides = array<i32>} : memref<96x4xf32, #tpu.memory_space<vmem>>, vector<16x4xf32>,
    %c16 = arith.constant 16 : index
    %c0_11 = arith.constant 0 : index
    %12 = vector.load %arg9[%c16, %c0_11] : memref<96x4xf32, #tpu.memory_space<vmem>>, vector<64x4xf32>
    tpu.vector_store %arg9[%c16, %c0_11], %8 {strides = array<i32>} : memref<96x4xf32, #tpu.memory_space<vmem>>, vector<64x4xf32>,
    %13 = tpu.iota {dimensions = array<i32: 0>} : vector<64x1xi32>
    %c8_i32 = arith.constant 8 : i32
    %c0_i32 = arith.constant 0 : i32
    %14 = arith.cmpi eq, %c8_i32, %c0_i32 : i32
    %c1_i32 = arith.constant 1 : i32
    %15 = arith.select %14, %c1_i32, %c8_i32 : i32
    %16 = vector.broadcast %15 : i32 to vector<64x1xi32>
    %17 = arith.remsi %13, %16 : vector<64x1xi32>
    %c0_i32_12 = arith.constant 0 : i32
    %18 = vector.broadcast %c0_i32_12 : i32 to vector<64x1xi32>
    %19 = arith.cmpi ne, %17, %18 : vector<64x1xi32>
    %c0_i32_13 = arith.constant 0 : i32
    %20 = vector.broadcast %c0_i32_13 : i32 to vector<64x1xi32>
    %21 = arith.cmpi slt, %17, %20 : vector<64x1xi32>
    %c0_i32_14 = arith.constant 0 : i32
    %22 = arith.cmpi slt, %15, %c0_i32_14 : i32
    %23 = vector.broadcast %22 : i1 to vector<64x1xi1>
    %24 = vector.broadcast %23 : vector<64x1xi1> to vector<64x1xi1>
    %25 = arith.xori %21, %24 : vector<64x1xi1>
    %26 = arith.andi %25, %19 : vector<64x1xi1>
    %27 = vector.broadcast %15 : i32 to vector<64x1xi32>
    %28 = arith.addi %17, %27 : vector<64x1xi32>
    %29 = arith.select %26, %28, %17 : vector<64x1xi1>, vector<64x1xi32>
    %c0_i32_15 = arith.constant 0 : i32
    %30 = vector.broadcast %c0_i32_15 : i32 to vector<64x1xi32>
    %31 = arith.cmpi ne, %29, %30 : vector<64x1xi32>
    %32 = arith.extui %31 : vector<64x1xi1> to vector<64x1xi32>
    %33 = arith.sitofp %32 : vector<64x1xi32> to vector<64x1xf32>
    %c7_i32 = arith.constant 7 : i32
    %34 = vector.broadcast %c7_i32 : i32 to vector<64x1xi32>
    %35 = arith.cmpi ne, %29, %34 : vector<64x1xi32>
    %36 = arith.extui %35 : vector<64x1xi1> to vector<64x1xi32>
    %37 = arith.sitofp %36 : vector<64x1xi32> to vector<64x1xf32>
    %c7 = arith.constant 7 : index
    %c0_16 = arith.constant 0 : index
    %38 = vector.load %arg9[%c7, %c0_16] : memref<96x4xf32, #tpu.memory_space<vmem>>, vector<64x4xf32>
    %39 = vector.broadcast %33 : vector<64x1xf32> to vector<64x4xf32>
    %40 = arith.mulf %38, %39 : vector<64x4xf32>
    %c0_17 = arith.constant 0 : index
    %c0_18 = arith.constant 0 : index
    %41 = vector.load %arg10[%c0_17, %c0_18] : memref<64x36xf32, #tpu.memory_space<vmem>>, vector<64x4xf32>
    tpu.vector_store %arg10[%c0_17, %c0_18], %40 {strides = array<i32>} : memref<64x36xf32, #tpu.memory_space<vmem>>, vector<64x4xf32>,
    %c8 = arith.constant 8 : index
    %c0_19 = arith.constant 0 : index
    %42 = vector.load %arg9[%c8, %c0_19] : memref<96x4xf32, #tpu.memory_space<vmem>>, vector<64x4xf32>
    %c0_20 = arith.constant 0 : index
    %c4 = arith.constant 4 : index
    %43 = vector.load %arg10[%c0_20, %c4] : memref<64x36xf32, #tpu.memory_space<vmem>>, vector<64x4xf32>
    tpu.vector_store %arg10[%c0_20, %c4], %42 {strides = array<i32>} : memref<64x36xf32, #tpu.memory_space<vmem>>, vector<64x4xf32>,
    %c9 = arith.constant 9 : index
    %c0_21 = arith.constant 0 : index
    %44 = vector.load %arg9[%c9, %c0_21] : memref<96x4xf32, #tpu.memory_space<vmem>>, vector<64x4xf32>
    %45 = vector.broadcast %37 : vector<64x1xf32> to vector<64x4xf32>
    %46 = arith.mulf %44, %45 : vector<64x4xf32>
    %c0_22 = arith.constant 0 : index
    %c8_23 = arith.constant 8 : index
    %47 = vector.load %arg10[%c0_22, %c8_23] : memref<64x36xf32, #tpu.memory_space<vmem>>, vector<64x4xf32>
    tpu.vector_store %arg10[%c0_22, %c8_23], %46 {strides = array<i32>} : memref<64x36xf32, #tpu.memory_space<vmem>>, vector<64x4xf32>,
    %c15 = arith.constant 15 : index
    %c0_24 = arith.constant 0 : index
    %48 = vector.load %arg9[%c15, %c0_24] : memref<96x4xf32, #tpu.memory_space<vmem>>, vector<64x4xf32>
    %49 = vector.broadcast %33 : vector<64x1xf32> to vector<64x4xf32>
    %50 = arith.mulf %48, %49 : vector<64x4xf32>
    %c0_25 = arith.constant 0 : index
    %c12 = arith.constant 12 : index
    %51 = vector.load %arg10[%c0_25, %c12] : memref<64x36xf32, #tpu.memory_space<vmem>>, vector<64x4xf32>
    tpu.vector_store %arg10[%c0_25, %c12], %50 {strides = array<i32>} : memref<64x36xf32, #tpu.memory_space<vmem>>, vector<64x4xf32>,
    %c16_26 = arith.constant 16 : index
    %c0_27 = arith.constant 0 : index
    %52 = vector.load %arg9[%c16_26, %c0_27] : memref<96x4xf32, #tpu.memory_space<vmem>>, vector<64x4xf32>
    %c0_28 = arith.constant 0 : index
    %c16_29 = arith.constant 16 : index
    %53 = vector.load %arg10[%c0_28, %c16_29] : memref<64x36xf32, #tpu.memory_space<vmem>>, vector<64x4xf32>
    tpu.vector_store %arg10[%c0_28, %c16_29], %52 {strides = array<i32>} : memref<64x36xf32, #tpu.memory_space<vmem>>, vector<64x4xf32>,
    %c17 = arith.constant 17 : index
    %c0_30 = arith.constant 0 : index
    %54 = vector.load %arg9[%c17, %c0_30] : memref<96x4xf32, #tpu.memory_space<vmem>>, vector<64x4xf32>
    %55 = vector.broadcast %37 : vector<64x1xf32> to vector<64x4xf32>
    %56 = arith.mulf %54, %55 : vector<64x4xf32>
    %c0_31 = arith.constant 0 : index
    %c20 = arith.constant 20 : index
    %57 = vector.load %arg10[%c0_31, %c20] : memref<64x36xf32, #tpu.memory_space<vmem>>, vector<64x4xf32>
    tpu.vector_store %arg10[%c0_31, %c20], %56 {strides = array<i32>} : memref<64x36xf32, #tpu.memory_space<vmem>>, vector<64x4xf32>,
    %c23 = arith.constant 23 : index
    %c0_32 = arith.constant 0 : index
    %58 = vector.load %arg9[%c23, %c0_32] : memref<96x4xf32, #tpu.memory_space<vmem>>, vector<64x4xf32>
    %59 = vector.broadcast %33 : vector<64x1xf32> to vector<64x4xf32>
    %60 = arith.mulf %58, %59 : vector<64x4xf32>
    %c0_33 = arith.constant 0 : index
    %c24 = arith.constant 24 : index
    %61 = vector.load %arg10[%c0_33, %c24] : memref<64x36xf32, #tpu.memory_space<vmem>>, vector<64x4xf32>
    tpu.vector_store %arg10[%c0_33, %c24], %60 {strides = array<i32>} : memref<64x36xf32, #tpu.memory_space<vmem>>, vector<64x4xf32>,
    %c24_34 = arith.constant 24 : index
    %c0_35 = arith.constant 0 : index
    %62 = vector.load %arg9[%c24_34, %c0_35] : memref<96x4xf32, #tpu.memory_space<vmem>>, vector<64x4xf32>
    %c0_36 = arith.constant 0 : index
    %c28 = arith.constant 28 : index
    %63 = vector.load %arg10[%c0_36, %c28] : memref<64x36xf32, #tpu.memory_space<vmem>>, vector<64x4xf32>
    tpu.vector_store %arg10[%c0_36, %c28], %62 {strides = array<i32>} : memref<64x36xf32, #tpu.memory_space<vmem>>, vector<64x4xf32>,
    %c25 = arith.constant 25 : index
    %c0_37 = arith.constant 0 : index
    %64 = vector.load %arg9[%c25, %c0_37] : memref<96x4xf32, #tpu.memory_space<vmem>>, vector<64x4xf32>
    %65 = vector.broadcast %37 : vector<64x1xf32> to vector<64x4xf32>
    %66 = arith.mulf %64, %65 : vector<64x4xf32>
    %c0_38 = arith.constant 0 : index
    %c32 = arith.constant 32 : index
    %67 = vector.load %arg10[%c0_38, %c32] : memref<64x36xf32, #tpu.memory_space<vmem>>, vector<64x4xf32>
    tpu.vector_store %arg10[%c0_38, %c32], %66 {strides = array<i32>} : memref<64x36xf32, #tpu.memory_space<vmem>>, vector<64x4xf32>,
    %c0_39 = arith.constant 0 : index
    %c0_40 = arith.constant 0 : index
    %68 = vector.load %arg10[%c0_39, %c0_40] : memref<64x36xf32, #tpu.memory_space<vmem>>, vector<64x36xf32>
    %c0_41 = arith.constant 0 : index
    %c0_42 = arith.constant 0 : index
    %69 = vector.load %arg4[%c0_41, %c0_42] : memref<36x4xf32, #tpu.memory_space<vmem>>, vector<36x4xf32>
    %cst_43 = arith.constant dense<0.000000e+00> : vector<64x4xf32>
    %70 = tpu.matmul %68, %69, %cst_43 {dimension_numbers = #tpu.dot_dimension_numbers<[1], [0], [0], [1], [0, 0, 1, 1], [], []>} : vector<64x36xf32>, vector<36x4xf32>, vector<64x4xf32> -> vector<64x4xf32>
    %c0_44 = arith.constant 0 : index
    %c0_45 = arith.constant 0 : index
    %71 = vector.load %arg5[%c0_44, %c0_45] : memref<1x4xf32, #tpu.memory_space<vmem>>, vector<1x4xf32>
    %72 = vector.broadcast %71 : vector<1x4xf32> to vector<64x4xf32>
    %73 = arith.addf %70, %72 : vector<64x4xf32>
    %cst_46 = arith.constant 0.000000e+00 : f32
    %74 = vector.broadcast %cst_46 : f32 to vector<64x4xf32>
    %75 = arith.maximumf %73, %74 : vector<64x4xf32>
    %c0_47 = arith.constant 0 : index
    %c0_48 = arith.constant 0 : index
    %76 = vector.load %arg6[%c0_47, %c0_48] : memref<4x16xf32, #tpu.memory_space<vmem>>, vector<4x16xf32>
    %cst_49 = arith.constant dense<0.000000e+00> : vector<64x16xf32>
    %77 = tpu.matmul %75, %76, %cst_49 {dimension_numbers = #tpu.dot_dimension_numbers<[1], [0], [0], [1], [0, 0, 1, 1], [], []>} : vector<64x4xf32>, vector<4x16xf32>, vector<64x16xf32> -> vector<64x16xf32>
    %c0_50 = arith.constant 0 : index
    %c0_51 = arith.constant 0 : index
    %78 = vector.load %arg7[%c0_50, %c0_51] : memref<1x16xf32, #tpu.memory_space<vmem>>, vector<1x16xf32>
    %79 = vector.broadcast %78 : vector<1x16xf32> to vector<64x16xf32>
    %80 = arith.addf %77, %79 : vector<64x16xf32>
    %81 = arith.addf %80, %1 : vector<64x16xf32>
    %cst_52 = arith.constant 0.000000e+00 : f32
    %82 = vector.broadcast %cst_52 : f32 to vector<64x16xf32>
    %83 = arith.maximumf %81, %82 : vector<64x16xf32>
    %c0_53 = arith.constant 0 : index
    %c0_54 = arith.constant 0 : index
    %c0_55 = arith.constant 0 : index
    %84 = vector.load %arg8[%c0_53, %c0_54, %c0_55] : memref<1x64x16xf32, #tpu.memory_space<vmem>>, vector<1x64x16xf32>
    %85 = vector.shape_cast %84 : vector<1x64x16xf32> to vector<64x16xf32>
    %86 = vector.shape_cast %83 : vector<64x16xf32> to vector<1x64x16xf32>
    tpu.vector_store %arg8[%c0_53, %c0_54, %c0_55], %86 {strides = array<i32>} : memref<1x64x16xf32, #tpu.memory_space<vmem>>, vector<1x64x16xf32>,
    return
  }
  func.func @transform_0(%arg0: i32) -> (i32, i32, i32) {
    %c0_i32 = arith.constant 0 : i32
    %c0_i32_0 = arith.constant 0 : i32
    %c0_i32_1 = arith.constant 0 : i32
    return %arg0, %c0_i32, %c0_i32_0 : i32, i32, i32
  }
  func.func @transform_1(%arg0: i32) -> (i32, i32) {
    %c0_i32 = arith.constant 0 : i32
    %c0_i32_0 = arith.constant 0 : i32
    %c0_i32_1 = arith.constant 0 : i32
    return %c0_i32, %c0_i32_0 : i32, i32
  }
  func.func @transform_2(%arg0: i32) -> (i32, i32) {
    %c0_i32 = arith.constant 0 : i32
    %c0_i32_0 = arith.constant 0 : i32
    %c0_i32_1 = arith.constant 0 : i32
    return %c0_i32, %c0_i32_0 : i32, i32
  }
  func.func @transform_3(%arg0: i32) -> (i32, i32) {
    %c0_i32 = arith.constant 0 : i32
    %c0_i32_0 = arith.constant 0 : i32
    %c0_i32_1 = arith.constant 0 : i32
    return %c0_i32, %c0_i32_0 : i32, i32
  }
  func.func @transform_4(%arg0: i32) -> (i32, i32) {
    %c0_i32 = arith.constant 0 : i32
    %c0_i32_0 = arith.constant 0 : i32
    %c0_i32_1 = arith.constant 0 : i32
    return %c0_i32, %c0_i32_0 : i32, i32
  }
  func.func @transform_5(%arg0: i32) -> (i32, i32) {
    %c0_i32 = arith.constant 0 : i32
    %c0_i32_0 = arith.constant 0 : i32
    %c0_i32_1 = arith.constant 0 : i32
    return %c0_i32, %c0_i32_0 : i32, i32
  }
  func.func @transform_6(%arg0: i32) -> (i32, i32) {
    %c0_i32 = arith.constant 0 : i32
    %c0_i32_0 = arith.constant 0 : i32
    %c0_i32_1 = arith.constant 0 : i32
    return %c0_i32, %c0_i32_0 : i32, i32
  }
  func.func @transform_7(%arg0: i32) -> (i32, i32, i32) {
    %c0_i32 = arith.constant 0 : i32
    %c0_i32_0 = arith.constant 0 : i32
    %c0_i32_1 = arith.constant 0 : i32
    return %arg0, %c0_i32, %c0_i32_0 : i32, i32, i32
  }
}

</mosaic_0001>

<bundles_post_ra>
// kernel: tpu_custom_call.1
= control target key start
LH: loop header
LB: loop body
LE: loop exit
PB: predicated region body
PF: predicated region fallthrough
CT: control target
= control target key end

     0   :  { %s1657_s24 = smov 0   ;;  %s2101_s0 = inlined_call_operand.vmem [shape: f32[2,64,16], index: 0, kind: input, shape index: {}]   ;;  %s2102_s1 = inlined_call_operand.vmem [shape: f32[16,4], index: 1, kind: input, shape index: {}]   ;;  %s2103_s2 = inlined_call_operand.vmem [shape: f32[1,4], index: 2, kind: input, shape index: {}]   ;;  %s2104_s3 = inlined_call_operand.vmem [shape: f32[36,4], index: 3, kind: input, shape index: {}]   ;;  %s2105_s4 = inlined_call_operand.vmem [shape: f32[1,4], index: 4, kind: input, shape index: {}]   ;;  %s2106_s5 = inlined_call_operand.vmem [shape: f32[4,16], index: 5, kind: input, shape index: {}]   ;;  %s2107_s6 = inlined_call_operand.vmem [shape: f32[1,16], index: 6, kind: input, shape index: {}]   ;;  %s2108_s7 = inlined_call_operand.vmem [shape: f32[2,64,16], index: 7, kind: output, shape index: {}]  }
   0x1 LB: > { %s1437_s25 = sadd.s32 4294967295, %s1606_s24   ;;  %p1441_p0 = scmp.ge.s32.totalorder %s1606_s24, 1  ;;  %s1606_s24 = sphi %s1657_s24, %s17_s24  }
   0x2   : > { %p237_p1 = scmp.lt.s32.totalorder %s1606_s24, 3 }
   0x4   : > { %p238_p2 = pnand %p1441_p0, %p237_p1 }
   0x5   : > { %p269_p3 = scmp.lt.s32.totalorder (!%p238_p2), %s1437_s25, 1  ;;  %s1609_s11 = smov (!%p238_p2), 28  }
   0x6   : > { %241 = sbr.rel (%p238_p2) target bundleno = 868 (0x364), region = 48  ;;  %s1610_s12 = smov (!%p238_p2), 4  }
   0x7   : > { %s1611_s15 = smov (!%p238_p2), 16   ;;  %s1612_s16 = smov (!%p238_p2), 8  }
   0x8   : > { %s1613_s17 = smov (!%p238_p2), 12   ;;  %s1614_s18 = smov (!%p238_p2), 20  }
   0x9   : > { %s1615_s21 = smov (!%p238_p2), 24  }
   0xb   : > { %v288_v0 = vld [vmem:[%s2102_s1 + $0x8] sm:$0xff]  ;;  %v287_v1 = vld [vmem:[%s2102_s1] sm:$0xff]  ;;  %s2110_s25 = smov (!%p269_p3, %s1437_s25), 1  ;;  %vm296_vm0 = vcmask 130048   ;;  %vm434_vm1 = vcmask 31744   ;;  %v1608_v10 = vmov 0.0   ;;  %v447_v13 = vlaneseq }
   0xc   : > { %1527 = vmatprep.subr.mxu0 %v288_v0  ;;  %1579 = vmatprep.subr.mxu1 %v288_v0  ;;  %s1493_s30 = sshll.u32 %s2110_s25, 6  ;;  %437 = vst.msk [vmem:[#allocation2 + $0x50] sm:$0xff] %vm434_vm1, %v1608_v10  ;;  %435 = vst.msk [vmem:[#allocation2] sm:$0xff] %vm434_vm1, %v1608_v10  ;;  %vm664_vm3 = vcmask 64544   ;;  %v1446_v20 = vld [vmem:[%s2103_s2] ss:$0 sm:$0xff] }
   0xd   : > { %1528 = vmatpush3.msra.mxu0 %v288_v0  ;;  %1581 = vmatpush3.msra.mxu1 %v288_v0  ;;  %s273_s10 = scalar_lea.vmem %s2101_s0, %s1493_s30  ;;  %436 = vst.msk [vmem:[#allocation2 + $0x8] sm:$0xff] %vm434_vm1, %v1608_v10  ;;  %438 = vst.msk [vmem:[#allocation2 + $0x58] sm:$0xff] %vm434_vm1, %v1608_v10  ;;  %v1721_v14 = vshrl.u32 %v447_v13, 7  ;;  %vm1101_vm15 = vcmask 1043456   ;;  %s2073_s19 = scalar_lea.vmem %s2108_s7, %s1493_s30 }
   0xe   : > { %1529 = vmatprep.subr.mxu0 %v287_v1  ;;  %1580 = vmatprep.subr.mxu1 %v287_v1  ;;  %v1679_v2 = vld [vmem:[%s273_s10] sm:$0xff]  ;;  %v1681_v3 = vld [vmem:[%s273_s10 + $0x10] sm:$0xff]  ;;  %v1683_v4 = vld [vmem:[%s273_s10 + $0x8] sm:$0xff] }
   0xf   : > { %1530 = vmatpush3.msra.mxu0 %v287_v1  ;;  %1582 = vmatpush3.msra.mxu1 %v287_v1  ;;  %v1689_v5 = vld [vmem:[%s273_s10 + $0x18] sm:$0xff]  ;;  %v1691_v6 = vld [vmem:[%s273_s10 + $0x20] sm:$0xff]  ;;  %v1699_v7 = vld [vmem:[%s273_s10 + $0x28] sm:$0xff]  ;;  %v460_v15 = vand.u32 7, %v1721_v14  ;;  %v1741_v42 = vadd.s32 32, %v1721_v14  ;;  %v1744_v43 = vadd.s32 48, %v1721_v14 }
  0x10   : > { %1531 = vmatprep.mubr.msk.f32.mxu0 %vm296_vm0, %v1679_v2  ;;  %1534 = vmatprep.mubr.msk.f32.mxu1 %vm296_vm0, %v1681_v3  ;;  %v1701_v8 = vld [vmem:[%s273_s10 + $0x30] sm:$0xff]  ;;  %v1707_v9 = vld [vmem:[%s273_s10 + $0x38] sm:$0xff]  ;;  %v1748_v46 = vadd.s32 16, %v1721_v14  ;;  %v1751_v48 = vadd.s32 8, %v1721_v14  ;;  %v1754_v49 = vadd.s32 40, %v1721_v14  ;;  %v1759_v50 = vadd.s32 24, %v1721_v14 }
  0x11   : > { %1532 = vmatmul.mubr.msk.f32.vlgmr.msra.gmra.mxu0 %vm296_vm0, %v1683_v4  ;;  %1535 = vmatmul.mubr.msk.f32.vlgmr.msra.gmra.mxu1 %vm296_vm0, %v1689_v5  ;;  %vm552_vm2 = vcmp.ne.s32.totalorder %v460_v15, 0  ;;  %v1763_v52 = vadd.s32 56, %v1721_v14  ;;  %v488_v54 = vand.u32 7, %v1741_v42  ;;  %v502_v55 = vand.u32 7, %v1744_v43  ;;  %s1616_s10 = smov 32  }
  0x12   : > { %1537 = vmatprep.mubr.msk.f32.mxu1 %vm296_vm0, %v1691_v6  ;;  %v1727_v16 = vsel %vm552_vm2, 1.0, %v1608_v10  ;;  %v474_v56 = vand.u32 7, %v1748_v46  ;;  %v467_v57 = vand.u32 7, %v1751_v48  ;;  %v495_v58 = vand.u32 7, %v1754_v49 }
  0x13   : > { %v957_v11 = vld [vmem:[#allocation2 + $0x50] sm:$0xff]  ;;  %v481_v59 = vand.u32 7, %v1759_v50  ;;  %v509_v60 = vand.u32 7, %v1763_v52  ;;  %vm556_vm4 = vcmp.ne.s32.totalorder %v488_v54, 0  ;;  %vm558_vm5 = vcmp.ne.s32.totalorder %v502_v55, 0 }
  0x14   : > { %v624_v12 = vld [vmem:[#allocation2 + $0x8] sm:$0xff]  ;;  %980 = vrot.lane.b32.xlu1 %v957_v11, %s1609_s11  ;;  %vm554_vm6 = vcmp.ne.s32.totalorder %v474_v56, 0  ;;  %vm553_vm7 = vcmp.ne.s32.totalorder %v467_v57, 0  ;;  %vm557_vm8 = vcmp.ne.s32.totalorder %v495_v58, 0  ;;  %v1790_v63 = vsel %vm556_vm4, 1.0, %v1608_v10 }
  0x15   : > { %1538 = vmatmul.mubr.msk.f32.gmra.mxu1 %vm296_vm0, %v1699_v7  ;;  %640 = vrot.lane.b32.xlu0 %v624_v12, %s1610_s12  ;;  %v600_v17 = vld [vmem:[#allocation2 + $0x7] sm:$0xff]  ;;  %vm555_vm9 = vcmp.ne.s32.totalorder %v481_v59, 0  ;;  %vm559_vm10 = vcmp.ne.s32.totalorder %v509_v60, 0  ;;  %v1795_v0 = vsel %vm558_vm5, 1.0, %v1608_v10  ;;  %v1800_v11 = vsel %vm554_vm6, 1.0, %v1608_v10 }
  0x16   : > { %1540 = vmatprep.mubr.msk.f32.mxu1 %vm296_vm0, %v1701_v8  ;;  %v608_v18 = vmul.f32 %v1727_v16, %v600_v17  ;;  %v1456_v17 = vsel %vm553_vm7, 1.0, %v1608_v10  ;;  %vm576_vm11 = vcmp.ne.s32.totalorder %v460_v15, 7  ;;  %vm577_vm12 = vcmp.ne.s32.totalorder %v467_v57, 7 }
  0x17   : > { %vm579_vm13 = vcmp.ne.s32.totalorder %v481_v59, 7  ;;  %vm578_vm14 = vcmp.ne.s32.totalorder %v474_v56, 7  ;;  %v1068_v59 = vld [vmem:[%s2104_s3 + $0x20] sm:$0xf]  ;;  %vm581_vm2 = vcmp.ne.s32.totalorder %v495_v58, 7  ;;  %vm580_vm4 = vcmp.ne.s32.totalorder %v488_v54, 7 }
  0x18   : > { %616 = vst.msk [vmem:[#allocation3] sm:$0xff] %vm434_vm1, %v608_v18  ;;  %v1871_v50 = vsel %vm578_vm14, 1.0, %v1608_v10  ;;  %1543 = vmatprep.subr.msk.mxu1 %vm1101_vm15, %v1068_v59  ;;  %v1467_v58 = vsel %vm580_vm4, 1.0, %v1608_v10  ;;  %vm583_vm5 = vcmp.ne.s32.totalorder %v509_v60, 7  ;;  %vm582_vm6 = vcmp.ne.s32.totalorder %v502_v55, 7 }
  0x19   : > { %1541 = vmatmul.mubr.msk.f32.gmra.mxu1 %vm296_vm0, %v1707_v9  ;;  %vm721_vm7 = vcmask 97344   ;;  %vm1076_vm14 = vcmask 293888  }
  0x1a   : > { %1544 = vmatpush3.msk.msra.mxu1 %vm1101_vm15, %v1068_v59 }
  0x86   : > { %v1967_v43 = vpop.permute.xlu1 %980 }
  0x87   : > { %v641_v19 = vpop.permute.xlu0 %640 }
  0x88   : > { %665 = vst.msk [vmem:[#allocation3] sm:$0xff] %vm664_vm3, %v641_v19  ;;  %v1810_v19 = vsel %vm557_vm8, 1.0, %v1608_v10  ;;  %vm778_vm8 = vcmask 130144  }
  0xd1   : > { %v1533_v21 = vpop.f32.mrf.mxu0  ;;  %v1536_v22 = vpop.f32.mrf.mxu1 }
  0xd2   : > { %v393_v23 = vadd.f32 %v1533_v21, %v1446_v20  ;;  %v403_v24 = vadd.f32 %v1536_v22, %v1446_v20  ;;  %v1815_v22 = vsel %vm555_vm9, 1.0, %v1608_v10  ;;  %vm827_vm9 = vcmask 162944  }
  0xd3   : > { %v387_v25 = vpop.f32.mrf.mxu0  ;;  %v397_v26 = vpop.f32.mrf.mxu1 }
  0xd4   : > { %v427_v27 = vmax.f32 %v393_v23, 0.0  ;;  %v429_v28 = vmax.f32 %v403_v24, 0.0  ;;  %v388_v29 = vadd.f32 %v1446_v20, %v387_v25  ;;  %v398_v30 = vadd.f32 %v1446_v20, %v397_v26 }
  0xd5   : > { %v1539_v31 = vpop.f32.mrf.mxu1  ;;  %v1820_v24 = vsel %vm559_vm10, 1.0, %v1608_v10  ;;  %vm884_vm10 = vcmask 195744  }
  0xd6   : > { %440 = vst.msk [vmem:[#allocation2 + $0x18] sm:$0xff] %vm434_vm1, %v427_v27  ;;  %442 = vst.msk [vmem:[#allocation2 + $0x28] sm:$0xff] %vm434_vm1, %v429_v28  ;;  %v426_v32 = vmax.f32 %v388_v29, 0.0  ;;  %v428_v33 = vmax.f32 %v398_v30, 0.0  ;;  %v413_v34 = vadd.f32 %v1539_v31, %v1446_v20 }
  0xd7   : > { %v407_v35 = vpop.f32.mrf.mxu1 }
  0xd8   : > { %439 = vst.msk [vmem:[#allocation2 + $0x10] sm:$0xff] %vm434_vm1, %v426_v32  ;;  %441 = vst.msk [vmem:[#allocation2 + $0x20] sm:$0xff] %vm434_vm1, %v428_v33  ;;  %v431_v36 = vmax.f32 %v413_v34, 0.0  ;;  %v408_v37 = vadd.f32 %v1446_v20, %v407_v35  ;;  %v1463_v33 = vsel %vm576_vm11, 1.0, %v1608_v10  ;;  %vm941_vm11 = vcmask 228544  }
  0xd9   : > { %v1542_v38 = vpop.f32.mrf.mxu1 }
  0xda   : > { %444 = vst.msk [vmem:[#allocation2 + $0x38] sm:$0xff] %vm434_vm1, %v431_v36  ;;  %v430_v39 = vmax.f32 %v408_v37, 0.0  ;;  %v423_v40 = vadd.f32 %v1542_v38, %v1446_v20  ;;  %v1464_v36 = vsel %vm577_vm12, 1.0, %v1608_v10  ;;  %vm990_vm12 = vcmask 261344  }
  0xdb   : > { %v417_v41 = vpop.f32.mrf.mxu1 }
  0xdc   : > { %443 = vst.msk [vmem:[#allocation2 + $0x30] sm:$0xff] %vm434_vm1, %v430_v39  ;;  %v433_v44 = vmax.f32 %v423_v40, 0.0  ;;  %v418_v45 = vadd.f32 %v1446_v20, %v417_v41 }
  0xdd   : > { %v788_v47 = vld [vmem:[#allocation2 + $0x18] sm:$0xff]  ;;  %v628_v53 = vld [vmem:[#allocation2 + $0x28] sm:$0xff] }
  0xde   : > { %805 = vrot.lane.b32.xlu0 %v788_v47, %s1611_s15  ;;  %644 = vrot.lane.b32.xlu1 %v788_v47, %s1610_s12  ;;  %446 = vst.msk [vmem:[#allocation2 + $0x48] sm:$0xff] %vm434_vm1, %v433_v44  ;;  %v432_v51 = vmax.f32 %v418_v45, 0.0  ;;  %v1863_v45 = vsel %vm579_vm13, 1.0, %v1608_v10  ;;  %vm1047_vm13 = vcmask 294144  }
  0xdf   : > { %v625_v62 = vld [vmem:[#allocation2 + $0x10] sm:$0xff]  ;;  %v1807_v18 = vld [vmem:[#allocation2 + $0x27] sm:$0xff]  ;;  %v1812_v21 = vld [vmem:[#allocation2 + $0x1f] sm:$0xff] }
  0xe0   : > { %445 = vst.msk [vmem:[#allocation2 + $0x40] sm:$0xff] %vm434_vm1, %v432_v51  ;;  %v1797_v1 = vld [vmem:[#allocation2 + $0x17] sm:$0xff]  ;;  %v730_v13 = vld [vmem:[#allocation2 + $0xf] sm:$0xff]  ;;  %v612_v28 = vmul.f32 %v1790_v63, %v1807_v18  ;;  %v611_v30 = vmul.f32 %v1815_v22, %v1812_v21  ;;  %v789_v15 = vld [vmem:[#allocation2 + $0x20] sm:$0xff]  ;;  %v902_v57 = vmul.f32 %v1456_v17, %v1812_v21  ;;  %v741_v56 = vmul.f32 %v1815_v22, %v1807_v18 }
  0xe1   : > { %v610_v27 = vmul.f32 %v1800_v11, %v1797_v1  ;;  %v609_v29 = vmul.f32 %v1456_v17, %v730_v13  ;;  %v673_v34 = vld [vmem:[#allocation2 + $0x9] sm:$0xff]  ;;  %v674_v37 = vld [vmem:[#allocation2 + $0x11] sm:$0xff]  ;;  %v738_v39 = vmul.f32 %v1727_v16, %v730_v13  ;;  %v837_v40 = vld [vmem:[#allocation2 + $0x19] sm:$0xff]  ;;  %v739_v41 = vmul.f32 %v1456_v17, %v1797_v1 }
  0xe2   : > { %648 = vrot.lane.b32.xlu0 %v628_v53, %s1610_s12  ;;  %966 = vrot.lane.b32.xlu1 %v788_v47, %s1609_s11  ;;  %620 = vst.msk [vmem:[#allocation3 + $0x20] sm:$0xff] %vm434_vm1, %v612_v28  ;;  %619 = vst.msk [vmem:[#allocation3 + $0x18] sm:$0xff] %vm434_vm1, %v611_v30  ;;  %v681_v35 = vmul.f32 %v1463_v33, %v673_v34  ;;  %v682_v38 = vmul.f32 %v1464_v36, %v674_v37  ;;  %v676_v47 = vld [vmem:[#allocation2 + $0x21] sm:$0xff]  ;;  %v1066_v13 = vld [vmem:[%s2104_s3 + $0x10] sm:$0xff] }
  0xe3   : > { %v1781_v61 = vld [vmem:[#allocation2 + $0x37] sm:$0xff]  ;;  %v1817_v23 = vld [vmem:[#allocation2 + $0x2f] sm:$0xff]  ;;  %618 = vst.msk [vmem:[#allocation3 + $0x10] sm:$0xff] %vm434_vm1, %v610_v27  ;;  %617 = vst.msk [vmem:[#allocation3 + $0x8] sm:$0xff] %vm434_vm1, %v609_v29  ;;  %v845_v44 = vmul.f32 %v1464_v36, %v837_v40  ;;  %v844_v48 = vmul.f32 %v1463_v33, %v674_v37  ;;  %v684_v51 = vmul.f32 %v1863_v45, %v676_v47 }
  0xe4   : > { %v1804_v12 = vmul.f32 %v1790_v63, %v1781_v61  ;;  %v614_v31 = vmul.f32 %v1795_v0, %v1781_v61  ;;  %v613_v32 = vmul.f32 %v1810_v19, %v1817_v23  ;;  %v901_v46 = vmul.f32 %v1727_v16, %v1797_v1  ;;  %v1065_v17 = vld [vmem:[%s2104_s3 + $0x8] sm:$0xff]  ;;  %v629_v29 = vld [vmem:[#allocation2 + $0x30] sm:$0xff] }
  0xe5   : > { %v740_v16 = vmul.f32 %v1800_v11, %v1812_v21  ;;  %v846_v1 = vmul.f32 %v1871_v50, %v676_v47  ;;  %v1007_v27 = vmul.f32 %v1463_v33, %v837_v40  ;;  %v1064_v21 = vld [vmem:[%s2104_s3] sm:$0xff]  ;;  %v1008_v28 = vmul.f32 %v1464_v36, %v676_v47 }
  0xe6   : > { %809 = vrot.lane.b32.xlu1 %v628_v53, %s1611_s15  ;;  %642 = vrot.lane.b32.xlu0 %v625_v62, %s1610_s12  ;;  %622 = vst.msk [vmem:[#allocation3 + $0x30] sm:$0xff] %vm434_vm1, %v614_v31  ;;  %621 = vst.msk [vmem:[#allocation3 + $0x28] sm:$0xff] %vm434_vm1, %v613_v32  ;;  %v903_v30 = vmul.f32 %v1800_v11, %v1807_v18  ;;  %v839_v31 = vld [vmem:[#allocation2 + $0x29] sm:$0xff]  ;;  %v904_v49 = vmul.f32 %v1815_v22, %v1817_v23 }
  0xe7   : > { %v898_v20 = vld [vmem:[#allocation2 + $0x3f] sm:$0xff]  ;;  %v847_v32 = vmul.f32 %v1863_v45, %v839_v31  ;;  %v685_v11 = vmul.f32 %v1467_v58, %v839_v31  ;;  %v743_v18 = vmul.f32 %v1810_v19, %v1781_v61  ;;  %v742_v42 = vmul.f32 %v1790_v63, %v1817_v23  ;;  %v794_v22 = vld [vmem:[#allocation2 + $0x48] sm:$0xff] }
  0xe8   : > { %v1823_v25 = vmul.f32 %v1810_v19, %v898_v20  ;;  %v1826_v26 = vmul.f32 %v1795_v0, %v898_v20  ;;  %v615_v14 = vmul.f32 %v1820_v24, %v898_v20  ;;  %v630_v20 = vld [vmem:[#allocation2 + $0x38] sm:$0xff]  ;;  %v1009_v34 = vmul.f32 %v1871_v50, %v839_v31  ;;  %v631_v19 = vld [vmem:[#allocation2 + $0x40] sm:$0xff]  ;;  %v843_v23 = vld [vmem:[#allocation2 + $0x49] sm:$0xff] }
  0xe9   : > { %v1470_v63 = vsel %vm583_vm5, 1.0, %v1608_v10 }
  0xea   : > { %970 = vrot.lane.b32.xlu1 %v628_v53, %s1609_s11  ;;  %803 = vrot.lane.b32.xlu0 %v625_v62, %s1611_s15  ;;  %623 = vst.msk [vmem:[#allocation3 + $0x38] sm:$0xff] %vm434_vm1, %v615_v14  ;;  %v683_v53 = vmul.f32 %v1871_v50, %v837_v40  ;;  %v1067_v62 = vld [vmem:[%s2104_s3 + $0x18] sm:$0xff]  ;;  %v1468_v14 = vsel %vm581_vm2, 1.0, %v1608_v10  ;;  %v851_v36 = vmul.f32 %v1470_v63, %v843_v23 }
  0xeb   : > { %1545 = vmatprep.subr.mxu1 %v1067_v62 }
  0xec   : > { %1546 = vmatpush3.msra.mxu1 %v1067_v62 }
  0xed   : > { %1547 = vmatprep.subr.mxu1 %v1066_v13 }
  0xee   : > { %807 = vrot.lane.b32.xlu1 %v789_v15, %s1611_s15  ;;  %646 = vrot.lane.b32.xlu0 %v789_v15, %s1610_s12 }
  0xef   : > { %1548 = vmatpush3.msra.mxu1 %v1066_v13 }
  0xf0   : > { %1549 = vmatprep.subr.mxu1 %v1065_v17 }
  0xf1   : > { %1550 = vmatpush3.msra.mxu1 %v1065_v17 }
  0xf2   : > { %697 = vrot.lane.b32.xlu1 %v681_v35, %s1612_s16  ;;  %968 = vrot.lane.b32.xlu0 %v789_v15, %s1609_s11  ;;  %v678_v15 = vld [vmem:[#allocation2 + $0x31] sm:$0xff]  ;;  %v841_v35 = vld [vmem:[#allocation2 + $0x39] sm:$0xff] }
  0xf3   : > { %1551 = vmatprep.subr.mxu1 %v1064_v21  ;;  %v686_v33 = vmul.f32 %v1468_v14, %v678_v15  ;;  %v848_v54 = vmul.f32 %v1467_v58, %v678_v15  ;;  %v1010_v61 = vmul.f32 %v1863_v45, %v678_v15  ;;  %v849_v37 = vmul.f32 %v1468_v14, %v841_v35  ;;  %v1006_v45 = vld [vmem:[#allocation2 + $0x51] sm:$0xff] }
  0xf4   : > { %1552 = vmatpush3.msra.mxu1 %v1064_v21 }
  0xf6   : > { %699 = vrot.lane.b32.xlu1 %v682_v38, %s1612_s16  ;;  %754 = vrot.lane.b32.xlu0 %v738_v39, %s1613_s17  ;;  %v900_v38 = vld [vmem:[#allocation2 + $0x4f] sm:$0xff]  ;;  %v680_v39 = vld [vmem:[#allocation2 + $0x41] sm:$0xff] }
  0xf7   : > { %v908_v52 = vmul.f32 %v1820_v24, %v900_v38  ;;  %v688_v60 = vmul.f32 %v1470_v63, %v680_v39  ;;  %v1012_v55 = vmul.f32 %v1468_v14, %v680_v39 }
  0xfa   : > { %756 = vrot.lane.b32.xlu1 %v739_v41, %s1613_s17  ;;  %862 = vrot.lane.b32.xlu0 %v845_v44, %s1614_s18  ;;  %v737_v41 = vld [vmem:[#allocation2 + $0x47] sm:$0xff] }
  0xfb   : > { %v745_v44 = vmul.f32 %v1820_v24, %v737_v41  ;;  %v1014_v24 = vmul.f32 %v1470_v63, %v1006_v45 }
  0xfe   : > { %860 = vrot.lane.b32.xlu1 %v844_v48, %s1614_s18  ;;  %703 = vrot.lane.b32.xlu0 %v684_v51, %s1612_s16 }
 0x102   : > { %701 = vrot.lane.b32.xlu1 %v683_v53, %s1612_s16  ;;  %919 = vrot.lane.b32.xlu0 %v902_v57, %s1615_s21 }
 0x106   : > { %917 = vrot.lane.b32.xlu1 %v901_v46, %s1615_s21  ;;  %760 = vrot.lane.b32.xlu0 %v741_v56, %s1613_s17 }
 0x10a   : > { %758 = vrot.lane.b32.xlu1 %v740_v16, %s1613_s17  ;;  %864 = vrot.lane.b32.xlu0 %v846_v1, %s1614_s18 }
 0x10e   : > { %1023 = vrot.lane.b32.xlu1 %v1007_v27, %s1616_s10  ;;  %652 = vrot.lane.b32.xlu0 %v630_v20, %s1610_s12 }
 0x112   : > { %1025 = vrot.lane.b32.xlu1 %v1008_v28, %s1616_s10  ;;  %650 = vrot.lane.b32.xlu0 %v629_v29, %s1610_s12 }
 0x116   : > { %921 = vrot.lane.b32.xlu1 %v903_v30, %s1615_s21  ;;  %972 = vrot.lane.b32.xlu0 %v629_v29, %s1609_s11 }
 0x11a   : > { %813 = vrot.lane.b32.xlu1 %v630_v20, %s1611_s15  ;;  %866 = vrot.lane.b32.xlu0 %v847_v32, %s1614_s18 }
 0x11e   : > { %974 = vrot.lane.b32.xlu1 %v630_v20, %s1609_s11  ;;  %707 = vrot.lane.b32.xlu0 %v686_v33, %s1612_s16 }
 0x122   : > { %811 = vrot.lane.b32.xlu1 %v629_v29, %s1611_s15  ;;  %923 = vrot.lane.b32.xlu0 %v904_v49, %s1615_s21 }
 0x126   : > { %705 = vrot.lane.b32.xlu1 %v685_v11, %s1612_s16  ;;  %764 = vrot.lane.b32.xlu0 %v743_v18, %s1613_s17 }
 0x12a   : > { %762 = vrot.lane.b32.xlu1 %v742_v42, %s1613_s17  ;;  %868 = vrot.lane.b32.xlu0 %v848_v54, %s1614_s18 }
 0x12e   : > { %1027 = vrot.lane.b32.xlu1 %v1009_v34, %s1616_s10  ;;  %817 = vrot.lane.b32.xlu0 %v794_v22, %s1611_s15 }
 0x132   : > { %1029 = vrot.lane.b32.xlu1 %v1010_v61, %s1616_s10  ;;  %978 = vrot.lane.b32.xlu0 %v794_v22, %s1609_s11 }
 0x136   : > { %925 = vrot.lane.b32.xlu1 %v1804_v12, %s1615_s21  ;;  %654 = vrot.lane.b32.xlu0 %v631_v19, %s1610_s12  ;;  %v1469_v12 = vsel %vm582_vm6, 1.0, %v1608_v10  ;;  %v1011_v10 = vmul.f32 %v1467_v58, %v841_v35 }
 0x137   : > { %v687_v40 = vmul.f32 %v1469_v12, %v841_v35  ;;  %v850_v51 = vmul.f32 %v1469_v12, %v680_v39  ;;  %v1013_v53 = vmul.f32 %v1469_v12, %v843_v23 }
 0x13a   : > { %815 = vrot.lane.b32.xlu1 %v631_v19, %s1611_s15  ;;  %976 = vrot.lane.b32.xlu0 %v631_v19, %s1609_s11 }
 0x13e   : > { %874 = vrot.lane.b32.xlu1 %v851_v36, %s1614_s18  ;;  %870 = vrot.lane.b32.xlu0 %v849_v37, %s1614_s18 }
 0x142   : > { %931 = vrot.lane.b32.xlu1 %v908_v52, %s1615_s21  ;;  %711 = vrot.lane.b32.xlu0 %v688_v60, %s1612_s16 }
 0x146   : > { %709 = vrot.lane.b32.xlu1 %v687_v40, %s1612_s16  ;;  %927 = vrot.lane.b32.xlu0 %v1823_v25, %s1615_s21  ;;  %v907_v25 = vmul.f32 %v1795_v0, %v737_v41 }
 0x14a   : > { %766 = vrot.lane.b32.xlu1 %v1826_v26, %s1613_s17  ;;  %768 = vrot.lane.b32.xlu0 %v745_v44, %s1613_s17 }
 0x14e   : > { %1031 = vrot.lane.b32.xlu1 %v1011_v10, %s1616_s10  ;;  %1033 = vrot.lane.b32.xlu0 %v1012_v55, %s1616_s10 }
 0x150   : > { %v806_v47 = vpop.permute.xlu0 %805  ;;  %v645_v48 = vpop.permute.xlu1 %644 }
 0x151   : > { %667 = vst.msk [vmem:[#allocation3 + $0x10] sm:$0xff] %vm664_vm3, %v645_v48 }
 0x152   : > { %872 = vrot.lane.b32.xlu1 %v850_v51, %s1614_s18  ;;  %929 = vrot.lane.b32.xlu0 %v907_v25, %s1615_s21 }
 0x154   : > { %v649_v26 = vpop.permute.xlu0 %648  ;;  %v967_v50 = vpop.permute.xlu1 %966 }
 0x155   : > { %669 = vst.msk [vmem:[#allocation3 + $0x20] sm:$0xff] %vm664_vm3, %v649_v26 }
 0x156   : > { %1035 = vrot.lane.b32.xlu0 %v1013_v53, %s1616_s10  ;;  %1037 = vrot.lane.b32.xlu1 %v1014_v24, %s1616_s10 }
 0x158   : > { %v810_v57 = vpop.permute.xlu1 %809  ;;  %v643_v59 = vpop.permute.xlu0 %642 }
 0x159   : > { %666 = vst.msk [vmem:[#allocation3 + $0x8] sm:$0xff] %vm664_vm3, %v643_v59 }
 0x15c   : > { %v971_v0 = vpop.permute.xlu1 %970  ;;  %v804_v46 = vpop.permute.xlu0 %803 }
 0x160   : > { %v808_v56 = vpop.permute.xlu1 %807  ;;  %v647_v62 = vpop.permute.xlu0 %646 }
 0x161   : > { %668 = vst.msk [vmem:[#allocation3 + $0x18] sm:$0xff] %vm664_vm3, %v647_v62 }
 0x164   : > { %v698_v13 = vpop.permute.xlu1 %697  ;;  %v969_v16 = vpop.permute.xlu0 %968 }
 0x165   : > { %722 = vst.msk [vmem:[#allocation3] sm:$0xff] %vm721_vm7, %v698_v13 }
 0x168   : > { %v700_v1 = vpop.permute.xlu1 %699  ;;  %v755_v17 = vpop.permute.xlu0 %754 }
 0x169   : > { %723 = vst.msk [vmem:[#allocation3 + $0x8] sm:$0xff] %vm721_vm7, %v700_v1 }
 0x16a   : > { %779 = vst.msk [vmem:[#allocation3] sm:$0xff] %vm778_vm8, %v755_v17 }
 0x16b   : > { %828 = vst.msk [vmem:[#allocation3] sm:$0xff] %vm827_vm9, %v804_v46 }
 0x16c   : > { %v757_v20 = vpop.permute.xlu1 %756  ;;  %v863_v27 = vpop.permute.xlu0 %862 }
 0x16d   : > { %780 = vst.msk [vmem:[#allocation3 + $0x8] sm:$0xff] %vm778_vm8, %v757_v20  ;;  %v1218_v20 = vld [vmem:[%s2106_s5] sm:$0xf] }
 0x16e   : > { %829 = vst.msk [vmem:[#allocation3 + $0x8] sm:$0xff] %vm827_vm9, %v806_v47  ;;  %1565 = vmatprep.subr.msk.mxu0 %vm1101_vm15, %v1218_v20 }
 0x16f   : > { %886 = vst.msk [vmem:[#allocation3 + $0x8] sm:$0xff] %vm884_vm10, %v863_v27  ;;  %1566 = vmatpush3.msk.msra.mxu0 %vm1101_vm15, %v1218_v20  ;;  %v1471_v27 = vld [vmem:[%s2105_s4] ss:$0 sm:$0xff] }
 0x170   : > { %v861_v21 = vpop.permute.xlu1 %860  ;;  %v704_v28 = vpop.permute.xlu0 %703 }
 0x171   : > { %885 = vst.msk [vmem:[#allocation3] sm:$0xff] %vm884_vm10, %v861_v21 }
 0x172   : > { %725 = vst.msk [vmem:[#allocation3 + $0x18] sm:$0xff] %vm721_vm7, %v704_v28 }
 0x174   : > { %v702_v29 = vpop.permute.xlu1 %701  ;;  %v920_v30 = vpop.permute.xlu0 %919 }
 0x175   : > { %724 = vst.msk [vmem:[#allocation3 + $0x10] sm:$0xff] %vm721_vm7, %v702_v29 }
 0x176   : > { %943 = vst.msk [vmem:[#allocation3 + $0x8] sm:$0xff] %vm941_vm11, %v920_v30 }
 0x177   : > { %992 = vst.msk [vmem:[#allocation3 + $0x8] sm:$0xff] %vm990_vm12, %v969_v16 }
 0x178   : > { %v918_v31 = vpop.permute.xlu1 %917  ;;  %v761_v32 = vpop.permute.xlu0 %760 }
 0x179   : > { %942 = vst.msk [vmem:[#allocation3] sm:$0xff] %vm941_vm11, %v918_v31 }
 0x17a   : > { %782 = vst.msk [vmem:[#allocation3 + $0x18] sm:$0xff] %vm778_vm8, %v761_v32 }
 0x17b   : > { %831 = vst.msk [vmem:[#allocation3 + $0x18] sm:$0xff] %vm827_vm9, %v810_v57 }
 0x17c   : > { %991 = vst.msk [vmem:[#allocation3] sm:$0xff] %vm990_vm12, %v967_v50  ;;  %v759_v14 = vpop.permute.xlu1 %758  ;;  %v865_v15 = vpop.permute.xlu0 %864 }
 0x17d   : > { %781 = vst.msk [vmem:[#allocation3 + $0x10] sm:$0xff] %vm778_vm8, %v759_v14 }
 0x17e   : > { %830 = vst.msk [vmem:[#allocation3 + $0x10] sm:$0xff] %vm827_vm9, %v808_v56 }
 0x17f   : > { %887 = vst.msk [vmem:[#allocation3 + $0x10] sm:$0xff] %vm884_vm10, %v865_v15 }
 0x180   : > { %v1024_v33 = vpop.permute.xlu1 %1023  ;;  %v653_v49 = vpop.permute.xlu0 %652 }
 0x181   : > { %1048 = vst.msk [vmem:[#allocation3] sm:$0xff] %vm1047_vm13, %v1024_v33 }
 0x182   : > { %671 = vst.msk [vmem:[#allocation3 + $0x30] sm:$0xff] %vm664_vm3, %v653_v49 }
 0x184   : > { %v1026_v58 = vpop.permute.xlu1 %1025  ;;  %v651_v11 = vpop.permute.xlu0 %650 }
 0x185   : > { %1049 = vst.msk [vmem:[#allocation3 + $0x8] sm:$0xff] %vm1047_vm13, %v1026_v58 }
 0x186   : > { %670 = vst.msk [vmem:[#allocation3 + $0x28] sm:$0xff] %vm664_vm3, %v651_v11 }
 0x188   : > { %v922_v18 = vpop.permute.xlu1 %921  ;;  %v973_v42 = vpop.permute.xlu0 %972  ;;  %v1056_v54 = vld [vmem:[#allocation3] sm:$0xff] }
 0x189   : > { %944 = vst.msk [vmem:[#allocation3 + $0x10] sm:$0xff] %vm941_vm11, %v922_v18  ;;  %1553 = vmatprep.mubr.msk.f32.mxu1 %vm1076_vm14, %v1056_v54 }
 0x18a   : > { %993 = vst.msk [vmem:[#allocation3 + $0x10] sm:$0xff] %vm990_vm12, %v971_v0 }
 0x18c   : > { %v814_v22 = vpop.permute.xlu1 %813  ;;  %v867_v34 = vpop.permute.xlu0 %866  ;;  %v1057_v61 = vld [vmem:[#allocation3 + $0x8] sm:$0xff] }
 0x18d   : > { %888 = vst.msk [vmem:[#allocation3 + $0x18] sm:$0xff] %vm884_vm10, %v867_v34  ;;  %1554 = vmatmul.mubr.msk.f32.vlgmr.msra.gmra.mxu1 %vm1076_vm14, %v1057_v61 }
 0x190   : > { %v975_v19 = vpop.permute.xlu1 %974  ;;  %v708_v63 = vpop.permute.xlu0 %707 }
 0x191   : > { %727 = vst.msk [vmem:[#allocation3 + $0x28] sm:$0xff] %vm721_vm7, %v708_v63 }
 0x194   : > { %v812_v23 = vpop.permute.xlu1 %811  ;;  %v924_v35 = vpop.permute.xlu0 %923 }
 0x195   : > { %945 = vst.msk [vmem:[#allocation3 + $0x18] sm:$0xff] %vm941_vm11, %v924_v35 }
 0x196   : > { %994 = vst.msk [vmem:[#allocation3 + $0x18] sm:$0xff] %vm990_vm12, %v973_v42 }
 0x198   : > { %v706_v36 = vpop.permute.xlu1 %705  ;;  %v765_v37 = vpop.permute.xlu0 %764 }
 0x199   : > { %726 = vst.msk [vmem:[#allocation3 + $0x20] sm:$0xff] %vm721_vm7, %v706_v36 }
 0x19a   : > { %784 = vst.msk [vmem:[#allocation3 + $0x28] sm:$0xff] %vm778_vm8, %v765_v37 }
 0x19b   : > { %833 = vst.msk [vmem:[#allocation3 + $0x28] sm:$0xff] %vm827_vm9, %v814_v22 }
 0x19c   : > { %v763_v38 = vpop.permute.xlu1 %762  ;;  %v869_v39 = vpop.permute.xlu0 %868 }
 0x19d   : > { %783 = vst.msk [vmem:[#allocation3 + $0x20] sm:$0xff] %vm778_vm8, %v763_v38  ;;  %v1481_v38 = vld [vmem:[%s2107_s6] ss:$0 sm:$0xff] }
 0x19e   : > { %832 = vst.msk [vmem:[#allocation3 + $0x20] sm:$0xff] %vm827_vm9, %v812_v23 }
 0x19f   : > { %889 = vst.msk [vmem:[#allocation3 + $0x20] sm:$0xff] %vm884_vm10, %v869_v39 }
 0x1a0   : > { %v1028_v52 = vpop.permute.xlu1 %1027  ;;  %v818_v60 = vpop.permute.xlu0 %817 }
 0x1a1   : > { %1050 = vst.msk [vmem:[#allocation3 + $0x10] sm:$0xff] %vm1047_vm13, %v1028_v52 }
 0x1a4   : > { %v1030_v12 = vpop.permute.xlu1 %1029  ;;  %v979_v40 = vpop.permute.xlu0 %978 }
 0x1a5   : > { %1051 = vst.msk [vmem:[#allocation3 + $0x18] sm:$0xff] %vm1047_vm13, %v1030_v12 }
 0x1a8   : > { %v926_v41 = vpop.permute.xlu1 %925  ;;  %v655_v44 = vpop.permute.xlu0 %654  ;;  %v1058_v10 = vld [vmem:[#allocation3 + $0x10] sm:$0xff] }
 0x1a9   : > { %946 = vst.msk [vmem:[#allocation3 + $0x20] sm:$0xff] %vm941_vm11, %v926_v41  ;;  %1556 = vmatprep.mubr.msk.f32.mxu1 %vm1076_vm14, %v1058_v10 }
 0x1aa   : > { %672 = vst.msk [vmem:[#allocation3 + $0x38] sm:$0xff] %vm664_vm3, %v655_v44 }
 0x1ab   : > { %995 = vst.msk [vmem:[#allocation3 + $0x20] sm:$0xff] %vm990_vm12, %v975_v19 }
 0x1ac   : > { %v816_v55 = vpop.permute.xlu1 %815  ;;  %v977_v45 = vpop.permute.xlu0 %976  ;;  %v1059_v47 = vld [vmem:[#allocation3 + $0x18] sm:$0xff] }
 0x1ad   : > { %1557 = vmatmul.mubr.msk.f32.gmra.mxu1 %vm1076_vm14, %v1059_v47 }
 0x1b0   : > { %v875_v48 = vpop.permute.xlu1 %874  ;;  %v871_v51 = vpop.permute.xlu0 %870 }
 0x1b1   : > { %890 = vst.msk [vmem:[#allocation3 + $0x28] sm:$0xff] %vm884_vm10, %v871_v51 }
 0x1b4   : > { %v932_v25 = vpop.permute.xlu1 %931  ;;  %v712_v24 = vpop.permute.xlu0 %711 }
 0x1b5   : > { %729 = vst.msk [vmem:[#allocation3 + $0x38] sm:$0xff] %vm721_vm7, %v712_v24 }
 0x1b8   : > { %v710_v26 = vpop.permute.xlu1 %709  ;;  %v928_v50 = vpop.permute.xlu0 %927 }
 0x1b9   : > { %728 = vst.msk [vmem:[#allocation3 + $0x30] sm:$0xff] %vm721_vm7, %v710_v26 }
 0x1ba   : > { %947 = vst.msk [vmem:[#allocation3 + $0x28] sm:$0xff] %vm941_vm11, %v928_v50 }
 0x1bb   : > { %996 = vst.msk [vmem:[#allocation3 + $0x28] sm:$0xff] %vm990_vm12, %v977_v45 }
 0x1bc   : > { %v767_v53 = vpop.permute.xlu1 %766  ;;  %v769_v57 = vpop.permute.xlu0 %768 }
 0x1bd   : > { %785 = vst.msk [vmem:[#allocation3 + $0x30] sm:$0xff] %vm778_vm8, %v767_v53  ;;  %786 = vst.msk [vmem:[#allocation3 + $0x38] sm:$0xff] %vm778_vm8, %v769_v57 }
 0x1be   : > { %834 = vst.msk [vmem:[#allocation3 + $0x30] sm:$0xff] %vm827_vm9, %v816_v55  ;;  %835 = vst.msk [vmem:[#allocation3 + $0x38] sm:$0xff] %vm827_vm9, %v818_v60 }
 0x1bf   : > { %892 = vst.msk [vmem:[#allocation3 + $0x38] sm:$0xff] %vm884_vm10, %v875_v48 }
 0x1c0   : > { %949 = vst.msk [vmem:[#allocation3 + $0x38] sm:$0xff] %vm941_vm11, %v932_v25  ;;  %v1032_v59 = vpop.permute.xlu1 %1031  ;;  %v1034_v0 = vpop.permute.xlu0 %1033 }
 0x1c1   : > { %1052 = vst.msk [vmem:[#allocation3 + $0x20] sm:$0xff] %vm1047_vm13, %v1032_v59  ;;  %1053 = vst.msk [vmem:[#allocation3 + $0x28] sm:$0xff] %vm1047_vm13, %v1034_v0 }
 0x1c2   : > { %998 = vst.msk [vmem:[#allocation3 + $0x38] sm:$0xff] %vm990_vm12, %v1967_v43 }
 0x1c4   : > { %v873_v46 = vpop.permute.xlu1 %872  ;;  %v930_v56 = vpop.permute.xlu0 %929 }
 0x1c5   : > { %891 = vst.msk [vmem:[#allocation3 + $0x30] sm:$0xff] %vm884_vm10, %v873_v46 }
 0x1c6   : > { %948 = vst.msk [vmem:[#allocation3 + $0x30] sm:$0xff] %vm941_vm11, %v930_v56 }
 0x1c7   : > { %997 = vst.msk [vmem:[#allocation3 + $0x30] sm:$0xff] %vm990_vm12, %v979_v40 }
 0x1c8   : > { %v1036_v62 = vpop.permute.xlu0 %1035  ;;  %v1038_v13 = vpop.permute.xlu1 %1037  ;;  %v1060_v16 = vld [vmem:[#allocation3 + $0x20] sm:$0xff]  ;;  %v1061_v1 = vld [vmem:[#allocation3 + $0x28] sm:$0xff] }
 0x1c9   : > { %1054 = vst.msk [vmem:[#allocation3 + $0x30] sm:$0xff] %vm1047_vm13, %v1036_v62  ;;  %1055 = vst.msk [vmem:[#allocation3 + $0x38] sm:$0xff] %vm1047_vm13, %v1038_v13  ;;  %1559 = vmatprep.mubr.msk.f32.mxu1 %vm1076_vm14, %v1060_v16 }
 0x1ca   : > { %1560 = vmatmul.mubr.msk.f32.gmra.mxu1 %vm1076_vm14, %v1061_v1 }
 0x1d0   : > { %v1062_v43 = vld [vmem:[#allocation3 + $0x30] sm:$0xff]  ;;  %v1063_v17 = vld [vmem:[#allocation3 + $0x38] sm:$0xff] }
 0x1d1   : > { %1562 = vmatprep.mubr.msk.f32.mxu1 %vm1076_vm14, %v1062_v43 }
 0x1d2   : > { %1563 = vmatmul.mubr.msk.f32.gmra.mxu1 %vm1076_vm14, %v1063_v17 }
 0x24d   : > { %v1555_v21 = vpop.f32.mrf.mxu1 }
 0x24e   : > { %v1177_v28 = vadd.f32 %v1555_v21, %v1471_v27 }
 0x24f   : > { %v1171_v29 = vpop.f32.mrf.mxu1 }
 0x250   : > { %v1172_v30 = vadd.f32 %v1471_v27, %v1171_v29  ;;  %v1211_v32 = vmax.f32 %v1177_v28, 0.0 }
 0x252   : > { %v1210_v31 = vmax.f32 %v1172_v30, 0.0 }
 0x254   : > { %1567 = vmatprep.mubr.msk.f32.mxu0 %vm434_vm1, %v1210_v31 }
 0x255   : > { %1568 = vmatmul.mubr.msk.f32.vlgmr.msra.gmra.mxu0 %vm434_vm1, %v1211_v32 }
 0x26d   : > { %v1558_v14 = vpop.f32.mrf.mxu1 }
 0x26e   : > { %v1187_v15 = vadd.f32 %v1558_v14, %v1471_v27 }
 0x26f   : > { %v1181_v33 = vpop.f32.mrf.mxu1 }
 0x270   : > { %v1182_v49 = vadd.f32 %v1471_v27, %v1181_v33  ;;  %v1213_v11 = vmax.f32 %v1187_v15, 0.0 }
 0x272   : > { %v1212_v58 = vmax.f32 %v1182_v49, 0.0 }
 0x274   : > { %1570 = vmatprep.mubr.msk.f32.mxu0 %vm434_vm1, %v1212_v58 }
 0x275   : > { %1571 = vmatmul.mubr.msk.f32.gmra.mxu0 %vm434_vm1, %v1213_v11 }
 0x28a   : > { %v1561_v18 = vpop.f32.mrf.mxu1 }
 0x28b   : > { %v1197_v42 = vadd.f32 %v1561_v18, %v1471_v27 }
 0x28c   : > { %v1191_v54 = vpop.f32.mrf.mxu1 }
 0x28d   : > { %v1192_v22 = vadd.f32 %v1471_v27, %v1191_v54  ;;  %v1215_v61 = vmax.f32 %v1197_v42, 0.0 }
 0x28f   : > { %v1214_v34 = vmax.f32 %v1192_v22, 0.0 }
 0x291   : > { %1573 = vmatprep.mubr.msk.f32.mxu0 %vm434_vm1, %v1214_v34 }
 0x292   : > { %v1564_v19 = vpop.f32.mrf.mxu1  ;;  %1574 = vmatmul.mubr.msk.f32.gmra.mxu0 %vm434_vm1, %v1215_v61 }
 0x293   : > { %v1207_v63 = vadd.f32 %v1564_v19, %v1471_v27 }
 0x294   : > { %v1201_v23 = vpop.f32.mrf.mxu1 }
 0x295   : > { %v1202_v35 = vadd.f32 %v1471_v27, %v1201_v23  ;;  %v1217_v37 = vmax.f32 %v1207_v63, 0.0 }
 0x297   : > { %v1216_v36 = vmax.f32 %v1202_v35, 0.0 }
 0x299   : > { %1576 = vmatprep.mubr.msk.f32.mxu0 %vm434_vm1, %v1216_v36 }
 0x29a   : > { %1577 = vmatmul.mubr.msk.f32.gmra.mxu0 %vm434_vm1, %v1217_v37 }
 0x315   : > { %v1569_v39 = vpop.f32.mrf.mxu0 }
 0x316   : > { %v1325_v52 = vadd.f32 %v1569_v39, %v1481_v38 }
 0x317   : > { %v1319_v60 = vpop.f32.mrf.mxu0 }
 0x318   : > { %v1359_v12 = vadd.f32 %v1325_v52, %v1683_v4  ;;  %v1320_v40 = vadd.f32 %v1481_v38, %v1319_v60 }
 0x31a   : > { %v1367_v41 = vmax.f32 %v1359_v12, 0.0  ;;  %v1358_v44 = vadd.f32 %v1320_v40, %v1679_v2 }
 0x31c   : > { %1375 = vst.msk [vmem:[%s2073_s19 + $0x8] sm:$0xff] %vm296_vm0, %v1367_v41  ;;  %v1366_v10 = vmax.f32 %v1358_v44, 0.0 }
 0x31e   : > { %1374 = vst.msk [vmem:[%s2073_s19] sm:$0xff] %vm296_vm0, %v1366_v10 }
 0x335   : > { %v1572_v4 = vpop.f32.mrf.mxu0 }
 0x336   : > { %v1335_v55 = vadd.f32 %v1572_v4, %v1481_v38 }
 0x337   : > { %v1329_v45 = vpop.f32.mrf.mxu0 }
 0x338   : > { %v1361_v47 = vadd.f32 %v1335_v55, %v1689_v5  ;;  %v1330_v48 = vadd.f32 %v1481_v38, %v1329_v45 }
 0x33a   : > { %v1369_v51 = vmax.f32 %v1361_v47, 0.0  ;;  %v1360_v25 = vadd.f32 %v1330_v48, %v1681_v3 }
 0x33c   : > { %1377 = vst.msk [vmem:[%s2073_s19 + $0x18] sm:$0xff] %vm296_vm0, %v1369_v51  ;;  %v1368_v24 = vmax.f32 %v1360_v25, 0.0 }
 0x33e   : > { %1376 = vst.msk [vmem:[%s2073_s19 + $0x10] sm:$0xff] %vm296_vm0, %v1368_v24 }
 0x352   : > { %v1575_v2 = vpop.f32.mrf.mxu0 }
 0x353   : > { %v1345_v26 = vadd.f32 %v1575_v2, %v1481_v38 }
 0x354   : > { %v1339_v50 = vpop.f32.mrf.mxu0 }
 0x355   : > { %v1363_v53 = vadd.f32 %v1345_v26, %v1699_v7  ;;  %v1340_v57 = vadd.f32 %v1481_v38, %v1339_v50 }
 0x357   : > { %v1371_v59 = vmax.f32 %v1363_v53, 0.0  ;;  %v1362_v5 = vadd.f32 %v1340_v57, %v1691_v6 }
 0x359   : > { %1379 = vst.msk [vmem:[%s2073_s19 + $0x28] sm:$0xff] %vm296_vm0, %v1371_v59  ;;  %v1370_v0 = vmax.f32 %v1362_v5, 0.0 }
 0x35a   : > { %v1578_v3 = vpop.f32.mrf.mxu0 }
 0x35b   : > { %1378 = vst.msk [vmem:[%s2073_s19 + $0x20] sm:$0xff] %vm296_vm0, %v1370_v0  ;;  %v1355_v46 = vadd.f32 %v1578_v3, %v1481_v38 }
 0x35c   : > { %v1349_v56 = vpop.f32.mrf.mxu0 }
 0x35d   : > { %v1365_v62 = vadd.f32 %v1355_v46, %v1707_v9  ;;  %v1350_v13 = vadd.f32 %v1481_v38, %v1349_v56 }
 0x35f   : > { %v1373_v16 = vmax.f32 %v1365_v62, 0.0  ;;  %v1364_v1 = vadd.f32 %v1350_v13, %v1701_v8 }
 0x361   : > { %1381 = vst.msk [vmem:[%s2073_s19 + $0x38] sm:$0xff] %vm296_vm0, %v1373_v16  ;;  %v1372_v7 = vmax.f32 %v1364_v1, 0.0 }
 0x363   : > { %1380 = vst.msk [vmem:[%s2073_s19 + $0x30] sm:$0xff] %vm296_vm0, %v1372_v7 }
 0x364 PF: > { %s17_s24 = sadd.s32 1, %s1606_s24  }
 0x365   : > { %p14_p4 = scmp.ge.s32.totalorder %s17_s24, 4  }
 0x367   :  { %16 = sbr.rel (!%p14_p4) target bundleno = 1 (0x1), region = 78 }

</bundles_post_ra>
